<compile_context>
chip_gen: v7x
topology: tpu7x:2x2x1
jax: 0.10.0
libtpu: 0.0.40
codegen_flags: <defaults>
</compile_context>

<pallas_src>
import functools
import math

import jax
import jax.numpy as jnp
from jax.experimental import pallas as pl
from jax.experimental.pallas import tpu as pltpu

EPS = 1e-5


def _round_up(x: int, m: int) -> int:
    return ((x + m - 1) // m) * m


def _vmem_capacity_bytes() -> int:
    try:
        cap = int(pltpu.get_tpu_info().vmem_capacity_bytes)
        if cap > 0:
            return cap
    except Exception:
        pass
    return 128 << 20  # v5e/v6e physical VMEM as a conservative fallback


def _spec(shape, index_map, *, single_buffer=False):
    """BlockSpec; constant-index operands get a single pipeline buffer."""
    if single_buffer:
        try:
            return pl.BlockSpec(shape, index_map, pipeline_mode=pl.Buffered(1))
        except (TypeError, AttributeError):
            pass  # older builds without pipeline_mode / Buffered
    return pl.BlockSpec(shape, index_map)


def _prenorm_kernel(x_ref, gamma_ref, beta_ref, w_ref, bias_ref, o_ref, y_ref, *, d_real):
    """One (row-tile i, W-column-tile j) grid point of LayerNorm(x) @ W + b."""
    j = pl.program_id(1)

    @pl.when(j == 0)
    def _():
        # LayerNorm in f32 on the VPU, single pass (sum & sum-of-squares).
        # Padded lanes of x are zero so no mask is needed for the statistics,
        # and gamma/beta zero-padding zeroes the padded lanes of y.
        x = x_ref[...].astype(jnp.float32)
        inv_d = jnp.float32(1.0 / d_real)
        mean = jnp.sum(x, axis=-1, keepdims=True) * inv_d
        ex2 = jnp.sum(x * x, axis=-1, keepdims=True) * inv_d
        var = ex2 - mean * mean                       # biased, like nn.LayerNorm
        x_hat = (x - mean) * jax.lax.rsqrt(var + EPS)
        y = x_hat * gamma_ref[...] + beta_ref[...]
        y_ref[...] = y.astype(y_ref.dtype)            # MXU operand dtype (bf16 default)

    out = jnp.dot(y_ref[...], w_ref[...], preferred_element_type=jnp.float32)
    o_ref[...] = (out + bias_ref[...]).astype(o_ref.dtype)


def prenorm_prepare_params(gamma, beta, w, bias, *, mxu_dtype=jnp.bfloat16):
    """Pad params to a lane-dense Dp and cast once (hoisted out of per-call path)."""
    D = int(w.shape[0])
    Dp = max(_round_up(D, 128), 128)
    pad = (0, Dp - D)
    return {
        "gamma": jnp.pad(gamma.astype(jnp.float32), pad).reshape(1, Dp),
        "beta": jnp.pad(beta.astype(jnp.float32), pad).reshape(1, Dp),
        "bias": jnp.pad(bias.astype(jnp.float32), pad).reshape(1, Dp),
        "w": jnp.pad(w.astype(mxu_dtype), (pad, pad)),
        "d": D,
    }


def prenorm_apply(x, params, *, block_rows=512):
    """PreNorm(dim, Linear(dim, dim)) on prepared params: x [..., D] -> [..., D]."""
    orig_dtype = x.dtype
    *lead, D = x.shape
    assert D == params["d"], "param/input hidden-dim mismatch"
    R = math.prod(lead) if lead else 1
    Dp = params["w"].shape[0]

    x_it = jnp.dtype(x.dtype).itemsize
    o_it = jnp.dtype(orig_dtype).itemsize
    w_it = jnp.dtype(params["w"].dtype).itemsize

    # ---- tiling plan -------------------------------------------------------
    cap = int(_vmem_capacity_bytes() * 0.78)     # ~50 MiB on v7x, ~100 MiB on v5e/v6e
    sub = max(8, 32 // x_it)                     # sublane packing (f32: 8, bf16: 16)

    # Row tile: >= 2 row-grid steps so both v7x TensorCores get work.
    TR = max(sub, min(block_rows, _round_up(pl.cdiv(R, 2), sub)))

    # W column tile: keep W fully resident (single buffer) if it fits in ~45%
    # of the budget, otherwise stream lane-dense (Dp, TN) column blocks.
    w_budget = int(cap * 0.45)
    if Dp * Dp * w_it <= w_budget:
        TN = Dp
    else:
        tn_max = max(128, ((w_budget // (2 * Dp * w_it)) // 128) * 128)
        TN, t = 128, 128
        while t <= min(tn_max, Dp):
            if Dp % t == 0:
                TN = t
            t += 128
    w_resident = TN == Dp

    def vmem_needed(tr):
        fixed = (1 if w_resident else 2) * Dp * TN * w_it + 2 * Dp * 4 + 2 * TN * 4
        per_tile = (2 * tr * Dp * x_it        # x tile (double-buffered)
                    + 2 * tr * TN * o_it      # out tile (double-buffered)
                    + tr * Dp * w_it          # y scratch
                    + 4 * tr * Dp * 4         # f32 LayerNorm temporaries
                    + tr * TN * 4)            # f32 matmul result
        return fixed + per_tile

    while TR > sub and vmem_needed(TR) > cap:
        TR = max(sub, _round_up(TR // 2, sub))

    vmem_limit = int(min(cap, max(2 * vmem_needed(TR), 32 << 20)))
    grid = (pl.cdiv(R, TR), Dp // TN)

    # ---- inputs (only D is zero-padded; rows handled by the cdiv grid) -----
    x2 = x.reshape(R, D)
    if Dp != D:
        x2 = jnp.pad(x2, ((0, 0), (0, Dp - D)))

    n_row_blocks = grid[0]
    cost = pl.CostEstimate(
        flops=2 * R * Dp * Dp,
        transcendentals=0,
        bytes_accessed=(R * Dp * (x_it + o_it)
                        + (1 if w_resident else n_row_blocks) * Dp * Dp * w_it
                        + 3 * Dp * 4),
    )

    def build_call(use_buffered):
        w_map = (lambda i, j: (0, 0)) if w_resident else (lambda i, j: (0, j))
        in_specs = [
            pl.BlockSpec((TR, Dp), lambda i, j: (i, 0)),                          # x
            _spec((1, Dp), lambda i, j: (0, 0), single_buffer=use_buffered),      # gamma
            _spec((1, Dp), lambda i, j: (0, 0), single_buffer=use_buffered),      # beta
            _spec((Dp, TN), w_map, single_buffer=use_buffered and w_resident),    # W
            _spec((1, TN), w_map, single_buffer=use_buffered and w_resident),     # bias
        ]
        return pl.pallas_call(
            functools.partial(_prenorm_kernel, d_real=D),
            out_shape=jax.ShapeDtypeStruct((R, Dp), orig_dtype),
            grid_spec=pltpu.PrefetchScalarGridSpec(
                num_scalar_prefetch=0,
                grid=grid,
                in_specs=in_specs,
                out_specs=pl.BlockSpec((TR, TN), lambda i, j: (i, j)),
                scratch_shapes=[pltpu.VMEM((TR, Dp), params["w"].dtype)],  # y = LN(x)
            ),
            compiler_params=pltpu.CompilerParams(
                dimension_semantics=("parallel", "arbitrary"),
                vmem_limit_bytes=vmem_limit,
            ),
            cost_estimate=cost,
        )

    args = (x2, params["gamma"], params["beta"], params["w"], params["bias"])
    try:
        out2 = build_call(True)(*args)
    except Exception:
        # Fallback if pipeline_mode=Buffered(1) is rejected by this build;
        # correctness is unaffected, only VMEM headroom.
        out2 = build_call(False)(*args)

    out2 = out2[:, :D] if Dp != D else out2
    return out2.reshape(*lead, D)


def prenorm(x, gamma, beta, w, bias, *, block_rows=512, mxu_dtype=jnp.bfloat16):
    """Convenience wrapper. Prefer prepare_params() once + apply() per call."""
    params = prenorm_prepare_params(gamma, beta, w, bias, mxu_dtype=mxu_dtype)
    return prenorm_apply(x, params, block_rows=block_rows)


def prenorm_ref(x, gamma, beta, w, bias):
    xf = x.astype(jnp.float32)
    mean = jnp.mean(xf, axis=-1, keepdims=True)
    var = jnp.mean((xf - mean) ** 2, axis=-1, keepdims=True)
    x_hat = (xf - mean) / jnp.sqrt(var + EPS)
    y = x_hat * gamma.astype(jnp.float32) + beta.astype(jnp.float32)
    return (y @ w.astype(jnp.float32) + bias.astype(jnp.float32)).astype(x.dtype)


if __name__ == "__main__":
    B, S, D = 2, 8, 32
    key = jax.random.PRNGKey(0)
    kx, kg, kb, kw, kbias = jax.random.split(key, 5)

    x = jax.random.normal(kx, (B, S, D), dtype=jnp.float32)
    # LayerNorm affine params (perturbed from the ones/zeros default so the
    # affine part is exercised) and fn = Linear(D, D).
    gamma = 1.0 + 0.1 * jax.random.normal(kg, (D,), dtype=jnp.float32)
    beta = 0.1 * jax.random.normal(kb, (D,), dtype=jnp.float32)
    w = jax.random.normal(kw, (D, D), dtype=jnp.float32) / jnp.sqrt(D)
    bias = 0.1 * jax.random.normal(kbias, (D,), dtype=jnp.float32)

    ref = prenorm_ref(x, gamma, beta, w, bias)

    # f32 MXU path: tight numerical check of the fused LayerNorm + matmul.
    params_f32 = prenorm_prepare_params(gamma, beta, w, bias, mxu_dtype=jnp.float32)
    out_f32 = prenorm_apply(x, params_f32)
    jax.block_until_ready(out_f32)
    assert out_f32.shape == (B, S, D)
    assert jnp.allclose(out_f32, ref, atol=2e-4, rtol=2e-4), "f32 path mismatch vs reference"

    # Ragged rows (R not a multiple of the row tile) exercise the cdiv grid /
    # clipped partial last row block.
    x_rag = x[:, :5, :]
    out_rag = prenorm_apply(x_rag, params_f32)
    jax.block_until_ready(out_rag)
    assert out_rag.shape == (B, 5, D)
    assert jnp.allclose(out_rag, prenorm_ref(x_rag, gamma, beta, w, bias),
                        atol=2e-4, rtol=2e-4), "ragged-row mismatch vs reference"

    # Default fast path: bf16 MXU operands with f32 accumulation.
    params_bf16 = prenorm_prepare_params(gamma, beta, w, bias)  # mxu_dtype=bf16
    out_bf16 = prenorm_apply(x, params_bf16)
    jax.block_until_ready(out_bf16)
    assert out_bf16.shape == (B, S, D)
    assert jnp.allclose(out_bf16, ref, atol=5e-2, rtol=5e-2), "bf16 path mismatch vs reference"

    print("KERNEL_OK")
</pallas_src>

<mosaic_0001>
module attributes {stable_mosaic.version = 11 : i64} {
  func.func @_prenorm_kernel(%arg0: i32, %arg1: i32, %arg2: memref<8x128xf32, #tpu.memory_space<vmem>>, %arg3: memref<1x128xf32, #tpu.memory_space<vmem>>, %arg4: memref<1x128xf32, #tpu.memory_space<vmem>>, %arg5: memref<128x128xf32, #tpu.memory_space<vmem>>, %arg6: memref<1x128xf32, #tpu.memory_space<vmem>>, %arg7: memref<8x128xf32, #tpu.memory_space<vmem>>, %arg8: memref<8x128xf32, #tpu.memory_space<vmem>>) attributes {dimension_semantics = [#tpu.dimension_semantics<parallel>, #tpu.dimension_semantics<arbitrary>], iteration_bounds = array<i64: 2, 1>, scalar_prefetch = 0 : i64, scratch_operands = 1 : i64, tpu.core_type = #tpu.core_type<tc>, window_params = [{transform_indices = @transform_0, window_bounds = array<i64: 8, 128>}, {pipeline_mode = #tpu.pipeline_mode<synchronous>, transform_indices = @transform_1, window_bounds = array<i64: 1, 128>}, {pipeline_mode = #tpu.pipeline_mode<synchronous>, transform_indices = @transform_2, window_bounds = array<i64: 1, 128>}, {pipeline_mode = #tpu.pipeline_mode<synchronous>, transform_indices = @transform_3, window_bounds = array<i64: 128, 128>}, {pipeline_mode = #tpu.pipeline_mode<synchronous>, transform_indices = @transform_4, window_bounds = array<i64: 1, 128>}, {transform_indices = @transform_5, window_bounds = array<i64: 8, 128>}]} {
    %c0_i32 = arith.constant 0 : i32
    %0 = arith.cmpi eq, %arg1, %c0_i32 : i32
    %1 = arith.extui %0 : i1 to i32
    %c0_i32_0 = arith.constant 0 : i32
    %2 = arith.cmpi ne, %1, %c0_i32_0 : i32
    scf.if %2 {
      %c0_8 = arith.constant 0 : index
      %c0_9 = arith.constant 0 : index
      %10 = vector.load %arg2[%c0_8, %c0_9] : memref<8x128xf32, #tpu.memory_space<vmem>>, vector<8x128xf32>
      %cst_10 = arith.constant dense<0.000000e+00> : vector<8xf32>
      %11 = vector.multi_reduction <add>, %10, %cst_10 [1] : vector<8x128xf32> to vector<8xf32>
      %12 = vector.shape_cast %11 : vector<8xf32> to vector<8x1xf32>
      %cst_11 = arith.constant 3.125000e-02 : f32
      %13 = vector.broadcast %cst_11 : f32 to vector<8x1xf32>
      %14 = arith.mulf %12, %13 : vector<8x1xf32>
      %15 = arith.mulf %10, %10 : vector<8x128xf32>
      %cst_12 = arith.constant dense<0.000000e+00> : vector<8xf32>
      %16 = vector.multi_reduction <add>, %15, %cst_12 [1] : vector<8x128xf32> to vector<8xf32>
      %17 = vector.shape_cast %16 : vector<8xf32> to vector<8x1xf32>
      %cst_13 = arith.constant 3.125000e-02 : f32
      %18 = vector.broadcast %cst_13 : f32 to vector<8x1xf32>
      %19 = arith.mulf %17, %18 : vector<8x1xf32>
      %20 = arith.mulf %14, %14 : vector<8x1xf32>
      %21 = arith.subf %19, %20 : vector<8x1xf32>
      %22 = vector.broadcast %14 : vector<8x1xf32> to vector<8x128xf32>
      %23 = arith.subf %10, %22 : vector<8x128xf32>
      %cst_14 = arith.constant 9.99999974E-6 : f32
      %24 = vector.broadcast %cst_14 : f32 to vector<8x1xf32>
      %25 = arith.addf %21, %24 : vector<8x1xf32>
      %26 = math.rsqrt %25 : vector<8x1xf32>
      %27 = vector.broadcast %26 : vector<8x1xf32> to vector<8x128xf32>
      %28 = arith.mulf %23, %27 : vector<8x128xf32>
      %c0_15 = arith.constant 0 : index
      %c0_16 = arith.constant 0 : index
      %29 = vector.load %arg3[%c0_15, %c0_16] : memref<1x128xf32, #tpu.memory_space<vmem>>, vector<1x128xf32>
      %30 = vector.broadcast %29 : vector<1x128xf32> to vector<8x128xf32>
      %31 = arith.mulf %28, %30 : vector<8x128xf32>
      %c0_17 = arith.constant 0 : index
      %c0_18 = arith.constant 0 : index
      %32 = vector.load %arg4[%c0_17, %c0_18] : memref<1x128xf32, #tpu.memory_space<vmem>>, vector<1x128xf32>
      %33 = vector.broadcast %32 : vector<1x128xf32> to vector<8x128xf32>
      %34 = arith.addf %31, %33 : vector<8x128xf32>
      %c0_19 = arith.constant 0 : index
      %c0_20 = arith.constant 0 : index
      %35 = vector.load %arg8[%c0_19, %c0_20] : memref<8x128xf32, #tpu.memory_space<vmem>>, vector<8x128xf32>
      tpu.vector_store %arg8[%c0_19, %c0_20], %34 {strides = array<i32>} : memref<8x128xf32, #tpu.memory_space<vmem>>, vector<8x128xf32>,
    } else {
    }
    %c0 = arith.constant 0 : index
    %c0_1 = arith.constant 0 : index
    %3 = vector.load %arg8[%c0, %c0_1] : memref<8x128xf32, #tpu.memory_space<vmem>>, vector<8x128xf32>
    %c0_2 = arith.constant 0 : index
    %c0_3 = arith.constant 0 : index
    %4 = vector.load %arg5[%c0_2, %c0_3] : memref<128x128xf32, #tpu.memory_space<vmem>>, vector<128x128xf32>
    %cst = arith.constant dense<0.000000e+00> : vector<8x128xf32>
    %5 = tpu.matmul %3, %4, %cst {dimension_numbers = #tpu.dot_dimension_numbers<[1], [0], [0], [1], [0, 0, 1, 1], [], []>} : vector<8x128xf32>, vector<128x128xf32>, vector<8x128xf32> -> vector<8x128xf32>
    %c0_4 = arith.constant 0 : index
    %c0_5 = arith.constant 0 : index
    %6 = vector.load %arg6[%c0_4, %c0_5] : memref<1x128xf32, #tpu.memory_space<vmem>>, vector<1x128xf32>
    %7 = vector.broadcast %6 : vector<1x128xf32> to vector<8x128xf32>
    %8 = arith.addf %5, %7 : vector<8x128xf32>
    %c0_6 = arith.constant 0 : index
    %c0_7 = arith.constant 0 : index
    %9 = vector.load %arg7[%c0_6, %c0_7] : memref<8x128xf32, #tpu.memory_space<vmem>>, vector<8x128xf32>
    tpu.vector_store %arg7[%c0_6, %c0_7], %8 {strides = array<i32>} : memref<8x128xf32, #tpu.memory_space<vmem>>, vector<8x128xf32>,
    return
  }
  func.func @transform_0(%arg0: i32, %arg1: i32) -> (i32, i32) {
    %c0_i32 = arith.constant 0 : i32
    %c0_i32_0 = arith.constant 0 : i32
    return %arg0, %c0_i32 : i32, i32
  }
  func.func @transform_1(%arg0: i32, %arg1: i32) -> (i32, i32) {
    %c0_i32 = arith.constant 0 : i32
    %c0_i32_0 = arith.constant 0 : i32
    %c0_i32_1 = arith.constant 0 : i32
    return %c0_i32, %c0_i32_0 : i32, i32
  }
  func.func @transform_2(%arg0: i32, %arg1: i32) -> (i32, i32) {
    %c0_i32 = arith.constant 0 : i32
    %c0_i32_0 = arith.constant 0 : i32
    %c0_i32_1 = arith.constant 0 : i32
    return %c0_i32, %c0_i32_0 : i32, i32
  }
  func.func @transform_3(%arg0: i32, %arg1: i32) -> (i32, i32) {
    %c0_i32 = arith.constant 0 : i32
    %c0_i32_0 = arith.constant 0 : i32
    %c0_i32_1 = arith.constant 0 : i32
    return %c0_i32, %c0_i32_0 : i32, i32
  }
  func.func @transform_4(%arg0: i32, %arg1: i32) -> (i32, i32) {
    %c0_i32 = arith.constant 0 : i32
    %c0_i32_0 = arith.constant 0 : i32
    %c0_i32_1 = arith.constant 0 : i32
    return %c0_i32, %c0_i32_0 : i32, i32
  }
  func.func @transform_5(%arg0: i32, %arg1: i32) -> (i32, i32) {
    %c0_i32 = arith.constant 0 : i32
    return %arg0, %arg1 : i32, i32
  }
}

module attributes {stable_mosaic.version = 11 : i64} {
  func.func @_prenorm_kernel(%arg0: i32, %arg1: i32, %arg2: memref<8x128xf32, #tpu.memory_space<vmem>>, %arg3: memref<1x128xf32, #tpu.memory_space<vmem>>, %arg4: memref<1x128xf32, #tpu.memory_space<vmem>>, %arg5: memref<128x128xf32, #tpu.memory_space<vmem>>, %arg6: memref<1x128xf32, #tpu.memory_space<vmem>>, %arg7: memref<8x128xf32, #tpu.memory_space<vmem>>, %arg8: memref<8x128xf32, #tpu.memory_space<vmem>>) attributes {dimension_semantics = [#tpu.dimension_semantics<parallel>, #tpu.dimension_semantics<arbitrary>], iteration_bounds = array<i64: 2, 1>, scalar_prefetch = 0 : i64, scratch_operands = 1 : i64, tpu.core_type = #tpu.core_type<tc>, window_params = [{transform_indices = @transform_0, window_bounds = array<i64: 8, 128>}, {pipeline_mode = #tpu.pipeline_mode<synchronous>, transform_indices = @transform_1, window_bounds = array<i64: 1, 128>}, {pipeline_mode = #tpu.pipeline_mode<synchronous>, transform_indices = @transform_2, window_bounds = array<i64: 1, 128>}, {pipeline_mode = #tpu.pipeline_mode<synchronous>, transform_indices = @transform_3, window_bounds = array<i64: 128, 128>}, {pipeline_mode = #tpu.pipeline_mode<synchronous>, transform_indices = @transform_4, window_bounds = array<i64: 1, 128>}, {transform_indices = @transform_5, window_bounds = array<i64: 8, 128>}]} {
    %c0_i32 = arith.constant 0 : i32
    %0 = arith.cmpi eq, %arg1, %c0_i32 : i32
    %1 = arith.extui %0 : i1 to i32
    %c0_i32_0 = arith.constant 0 : i32
    %2 = arith.cmpi ne, %1, %c0_i32_0 : i32
    scf.if %2 {
      %c0_8 = arith.constant 0 : index
      %c0_9 = arith.constant 0 : index
      %10 = vector.load %arg2[%c0_8, %c0_9] : memref<8x128xf32, #tpu.memory_space<vmem>>, vector<8x128xf32>
      %cst_10 = arith.constant dense<0.000000e+00> : vector<8xf32>
      %11 = vector.multi_reduction <add>, %10, %cst_10 [1] : vector<8x128xf32> to vector<8xf32>
      %12 = vector.shape_cast %11 : vector<8xf32> to vector<8x1xf32>
      %cst_11 = arith.constant 3.125000e-02 : f32
      %13 = vector.broadcast %cst_11 : f32 to vector<8x1xf32>
      %14 = arith.mulf %12, %13 : vector<8x1xf32>
      %15 = arith.mulf %10, %10 : vector<8x128xf32>
      %cst_12 = arith.constant dense<0.000000e+00> : vector<8xf32>
      %16 = vector.multi_reduction <add>, %15, %cst_12 [1] : vector<8x128xf32> to vector<8xf32>
      %17 = vector.shape_cast %16 : vector<8xf32> to vector<8x1xf32>
      %cst_13 = arith.constant 3.125000e-02 : f32
      %18 = vector.broadcast %cst_13 : f32 to vector<8x1xf32>
      %19 = arith.mulf %17, %18 : vector<8x1xf32>
      %20 = arith.mulf %14, %14 : vector<8x1xf32>
      %21 = arith.subf %19, %20 : vector<8x1xf32>
      %22 = vector.broadcast %14 : vector<8x1xf32> to vector<8x128xf32>
      %23 = arith.subf %10, %22 : vector<8x128xf32>
      %cst_14 = arith.constant 9.99999974E-6 : f32
      %24 = vector.broadcast %cst_14 : f32 to vector<8x1xf32>
      %25 = arith.addf %21, %24 : vector<8x1xf32>
      %26 = math.rsqrt %25 : vector<8x1xf32>
      %27 = vector.broadcast %26 : vector<8x1xf32> to vector<8x128xf32>
      %28 = arith.mulf %23, %27 : vector<8x128xf32>
      %c0_15 = arith.constant 0 : index
      %c0_16 = arith.constant 0 : index
      %29 = vector.load %arg3[%c0_15, %c0_16] : memref<1x128xf32, #tpu.memory_space<vmem>>, vector<1x128xf32>
      %30 = vector.broadcast %29 : vector<1x128xf32> to vector<8x128xf32>
      %31 = arith.mulf %28, %30 : vector<8x128xf32>
      %c0_17 = arith.constant 0 : index
      %c0_18 = arith.constant 0 : index
      %32 = vector.load %arg4[%c0_17, %c0_18] : memref<1x128xf32, #tpu.memory_space<vmem>>, vector<1x128xf32>
      %33 = vector.broadcast %32 : vector<1x128xf32> to vector<8x128xf32>
      %34 = arith.addf %31, %33 : vector<8x128xf32>
      %c0_19 = arith.constant 0 : index
      %c0_20 = arith.constant 0 : index
      %35 = vector.load %arg8[%c0_19, %c0_20] : memref<8x128xf32, #tpu.memory_space<vmem>>, vector<8x128xf32>
      tpu.vector_store %arg8[%c0_19, %c0_20], %34 {strides = array<i32>} : memref<8x128xf32, #tpu.memory_space<vmem>>, vector<8x128xf32>,
    } else {
    }
    %c0 = arith.constant 0 : index
    %c0_1 = arith.constant 0 : index
    %3 = vector.load %arg8[%c0, %c0_1] : memref<8x128xf32, #tpu.memory_space<vmem>>, vector<8x128xf32>
    %c0_2 = arith.constant 0 : index
    %c0_3 = arith.constant 0 : index
    %4 = vector.load %arg5[%c0_2, %c0_3] : memref<128x128xf32, #tpu.memory_space<vmem>>, vector<128x128xf32>
    %cst = arith.constant dense<0.000000e+00> : vector<8x128xf32>
    %5 = tpu.matmul %3, %4, %cst {dimension_numbers = #tpu.dot_dimension_numbers<[1], [0], [0], [1], [0, 0, 1, 1], [], []>} : vector<8x128xf32>, vector<128x128xf32>, vector<8x128xf32> -> vector<8x128xf32>
    %c0_4 = arith.constant 0 : index
    %c0_5 = arith.constant 0 : index
    %6 = vector.load %arg6[%c0_4, %c0_5] : memref<1x128xf32, #tpu.memory_space<vmem>>, vector<1x128xf32>
    %7 = vector.broadcast %6 : vector<1x128xf32> to vector<8x128xf32>
    %8 = arith.addf %5, %7 : vector<8x128xf32>
    %c0_6 = arith.constant 0 : index
    %c0_7 = arith.constant 0 : index
    %9 = vector.load %arg7[%c0_6, %c0_7] : memref<8x128xf32, #tpu.memory_space<vmem>>, vector<8x128xf32>
    tpu.vector_store %arg7[%c0_6, %c0_7], %8 {strides = array<i32>} : memref<8x128xf32, #tpu.memory_space<vmem>>, vector<8x128xf32>,
    return
  }
  func.func @transform_0(%arg0: i32, %arg1: i32) -> (i32, i32) {
    %c0_i32 = arith.constant 0 : i32
    %c0_i32_0 = arith.constant 0 : i32
    return %arg0, %c0_i32 : i32, i32
  }
  func.func @transform_1(%arg0: i32, %arg1: i32) -> (i32, i32) {
    %c0_i32 = arith.constant 0 : i32
    %c0_i32_0 = arith.constant 0 : i32
    %c0_i32_1 = arith.constant 0 : i32
    return %c0_i32, %c0_i32_0 : i32, i32
  }
  func.func @transform_2(%arg0: i32, %arg1: i32) -> (i32, i32) {
    %c0_i32 = arith.constant 0 : i32
    %c0_i32_0 = arith.constant 0 : i32
    %c0_i32_1 = arith.constant 0 : i32
    return %c0_i32, %c0_i32_0 : i32, i32
  }
  func.func @transform_3(%arg0: i32, %arg1: i32) -> (i32, i32) {
    %c0_i32 = arith.constant 0 : i32
    %c0_i32_0 = arith.constant 0 : i32
    %c0_i32_1 = arith.constant 0 : i32
    return %c0_i32, %c0_i32_0 : i32, i32
  }
  func.func @transform_4(%arg0: i32, %arg1: i32) -> (i32, i32) {
    %c0_i32 = arith.constant 0 : i32
    %c0_i32_0 = arith.constant 0 : i32
    %c0_i32_1 = arith.constant 0 : i32
    return %c0_i32, %c0_i32_0 : i32, i32
  }
  func.func @transform_5(%arg0: i32, %arg1: i32) -> (i32, i32) {
    %c0_i32 = arith.constant 0 : i32
    return %arg0, %arg1 : i32, i32
  }
}

</mosaic_0001>

<bundles_post_ra>
// kernel: tpu_custom_call.1
= control target key start
LH: loop header
LB: loop body
LE: loop exit
PB: predicated region body
PF: predicated region fallthrough
CT: control target
= control target key end

     0   :  { %10 = vsyncpa [#allocation4], 0  ;;  %s1088_s0 = inlined_call_operand.hbm [shape: f32[16,128], index: 0, kind: input, shape index: {}]   ;;  %s1089_s1 = inlined_call_operand.vmem [shape: f32[1,128], index: 1, kind: input, shape index: {}]   ;;  %s1090_s2 = inlined_call_operand.vmem [shape: f32[1,128], index: 2, kind: input, shape index: {}]   ;;  %s1091_s3 = inlined_call_operand.hbm [shape: f32[128,128], index: 3, kind: input, shape index: {}]   ;;  %s1092_s4 = inlined_call_operand.vmem [shape: f32[1,128], index: 4, kind: input, shape index: {}]   ;;  %s1093_s5 = inlined_call_operand.hbm [shape: f32[16,128], index: 5, kind: output, shape index: {}]  }
   0x1   :  { %12 = vsyncpa [#allocation4 + $0x1], 0 }
   0x2   :  { %13 = vsyncpa [#allocation7], 0 }
   0x3   :  { %14 = vsyncpa [#allocation5], 0 }
   0x4   :  { %16 = vsyncpa [#allocation5 + $0x1], 0  ;;  %s861_s18 = smov 0   ;;  %s863_s19 = smov 0  }
   0x5   :  { %s865_s20 = smov 0   ;;  %s867_s21 = smov 0  }
   0x6   :  { %s869_s22 = smov 0   ;;  %s871_s23 = smov 0  }
   0x7 LB: > { %s503_s24 = sadd.s32 4294967295, %s821_s23   ;;  %s504_s25 = sadd.s32 4294967294, %s821_s23   ;;  %s821_s23 = sphi %s871_s23, %s22_s23   ;;  %s817_s22 = sphi %s869_s22, %s1117_s22   ;;  %s813_s21 = sphi %s867_s21, %s1116_s21   ;;  %s809_s20 = sphi %s865_s20, %s1115_s20   ;;  %s805_s19 = sphi %s863_s19, %s1114_s19   ;;  %s801_s18 = sphi %s861_s18, %s1113_s18  }
   0x8   : > { %p54_p0 = scmp.ne.s32.totalorder %s805_s19, %s801_s18  ;;  %p895_p1 = scmp.eq.s32.totalorder %s503_s24, 0 }
   0x9   : > { %p899_p2 = scmp.eq.s32.totalorder %s503_s24, 1  ;;  %p170_p3 = scmp.eq.s32.totalorder %s504_s25, 1 }
   0xa   : > { %s1098_s26 = scalar_select %p895_p1, 1, 0 }
   0xb   : > { %s1099_s27 = scalar_select %p899_p2, 1, 0 }
   0xc   : > { %p905_p4 = por %p895_p1, %p54_p0  ;;  %p505_p5 = scmp.ge.s32.totalorder %s821_s23, 1 }
   0xd   : > { %p910_p6 = por %p170_p3, %p54_p0  ;;  %p177_p7 = scmp.lt.s32.totalorder %s821_s23, 3 }
   0xe   : > { %s1100_s28 = scalar_select %p905_p4, 1, 0 }
   0xf   : > { %s1101_s29 = scalar_select %p910_p6, 1, 0 }
  0x10   : > { %p915_p8 = pnand %p505_p5, %p177_p7  ;;  %s823_s6 = smov [#allocation6]  }
  0x11   : > { %s195_s7 = sshll.u32 %s823_s6, 4  ;;  %s34_s9 = sadd.s32 1, %s817_s22  ;;  %s196_s7 = int_to_ptr.vmem [resolvable:$true] %s195_s7 }
  0x12   : > { %s1102_s30 = scalar_select %p915_p8, 1, 0 }
  0x13   : > { %p605_p9 = pneg %p915_p8  ;;  %s677_s12 = scalar_lea.hbm %s1091_s3, 2048 }
  0x14   : > { %p678_p12 = scmp.ne.s32.totalorder %s1091_s3, %s677_s12  ;;  %p684_p5 = scmp.lt.u32.totalorder %s677_s12, %s1091_s3 }
  0x15   : > { %p924_p11 = pnand %p605_p9, %p895_p1 }
  0x17   : > { %p679_p13 = pneg %p924_p11 }
  0x19   : > { %p680_p0 = pnand %p679_p13, %p678_p12 }
  0x1b   : > { %p681_p3 = pneg %p680_p0 }
  0x1d   : > { %p686_p7 = pnand %p684_p5, %p681_p3 }
  0x1f   : > { %689 = shalt.err (!%p686_p7)
}
  0x20   : > { %s690_s17 = scalar_lea.vmem %s196_s7, 2048  ;;  %p698_p1 = scmp.lt.s32.totalorder %s196_s7, %s196_s7 }
  0x21   : > { %p691_p9 = scmp.ne.s32.totalorder %s196_s7, %s690_s17  ;;  %p699_p4 = scmp.lt.s32.totalorder %s690_s17, %s690_s17 }
  0x23   : > { %p693_p10 = pnand %p691_p9, %p679_p13  ;;  %p700_p8 = por %p699_p4, %p698_p1 }
  0x25   : > { %p694_p6 = pneg %p693_p10 }
  0x27   : > { %p701_p2 = pnand %p700_p8, %p694_p6 }
  0x29   : > { %704 = shalt.err (!%p701_p2)
}
  0x2a   : > { %s824_s24 = smov 128   ;;  %s825_s25 = smov 8  }
  0x2b   : > { %608 = dma.hbm_to_vmem [thread:$0]  (!%p924_p11), %s1091_s3, 2048, %s196_s7, [#allocation7], %s824_s24, %s824_s24, %s825_s25  }
  0x2c   : > { %p36_p1 = scmp.ge.s32.totalorder %s34_s9, 2  ;;  %s41_s11 = sadd.s32 1, %s809_s20 }
  0x2d   : > { %p48_p2 = scmp.ne.s32.totalorder %s809_s20, %s805_s19  ;;  %p49_p4 = scmp.eq.s32.totalorder %s821_s23, 0 }
  0x2e   : > { %s1119_s9 = smov (%p36_p1, %s34_s9), 0  ;;  %p1105_p8 = scmp.ne.s32.totalorder %s1099_s27, 0 }
  0x2f   : > { %p951_p6 = por %p49_p4, %p48_p2  ;;  %s38_s8 = ssub.s32 %s817_s22, %s1119_s9 }
  0x30   : > { %p957_p10 = por %p1105_p8, %p48_p2  ;;  %p618_p12 = scmp.lt.s32.totalorder %s821_s23, 2 }
  0x31   : > { %p39_p11 = scmp.eq.s32.totalorder %s38_s8, 0  ;;  %s212_s7 = sand.u32 1, %s809_s20  }
  0x32   : > { %s508_s14 = sshll.u32 %s212_s7, 3  ;;  %s509_s16 = sshll.u32 %s817_s22, 7 }
  0x33   : > { %s966_s15 = scalar_select %p39_p11, %s809_s20, %s41_s11  }
  0x34   : > { %s972_s25 = scalar_lea.hbm %s1088_s0, %s509_s16  ;;  %s216_s27 = scalar_lea.vmem [#allocation3], %s508_s14 }
  0x35   : > { %s223_s6 = sshll.u32 %s216_s27, 4  ;;  %p978_p13 = pnand %p618_p12, %p951_p6  ;;  %s974_s6 = int_to_ptr.vmem [resolvable:$true] %s223_s6 }
  0x36   : > { %s213_s11 = scalar_lea.sflag [#allocation4], %s212_s7  ;;  %s705_s8 = scalar_lea.hbm %s972_s25, 128 }
  0x37   : > { %p706_p0 = scmp.ne.s32.totalorder %s972_s25, %s705_s8  ;;  %p707_p3 = pneg %p978_p13 }
  0x38   : > { %s710_s17 = scalar_lea.hbm %s1088_s0, 256  ;;  %p711_p9 = scmp.lt.u32.totalorder %s972_s25, %s1088_s0 }
  0x39   : > { %p708_p5 = pnand %p707_p3, %p706_p0  ;;  %p712_p1 = scmp.lt.u32.totalorder %s710_s17, %s705_s8 }
  0x3a   : > { %p714_p4 = scmp.lt.u32.totalorder %s705_s8, %s972_s25 }
  0x3b   : > { %p709_p7 = pneg %p708_p5  ;;  %p713_p2 = por %p712_p1, %p711_p9 }
  0x3d   : > { %p715_p6 = por %p714_p4, %p713_p2 }
  0x3f   : > { %p716_p8 = pnand %p715_p6, %p709_p7 }
  0x41   : > { %719 = shalt.err (!%p716_p8)
}
  0x42   : > { %s720_s7 = scalar_lea.vmem %s974_s6, 128  ;;  %s826_s27 = smov [#allocation3]  }
  0x43   : > { %p721_p12 = scmp.ne.s32.totalorder %s974_s6, %s720_s7  ;;  %s725_s14 = sshll.u32 %s826_s27, 4  ;;  %s726_s14 = int_to_ptr.vmem [resolvable:$false] %s725_s14 }
  0x44   : > { %s727_s16 = scalar_lea.vmem %s726_s14, 256  ;;  %p728_p5 = scmp.lt.s32.totalorder %s974_s6, %s726_s14 }
  0x45   : > { %p723_p11 = pnand %p721_p12, %p707_p3  ;;  %p729_p9 = scmp.lt.s32.totalorder %s727_s16, %s720_s7 }
  0x47   : > { %p724_p0 = pneg %p723_p11  ;;  %p730_p1 = por %p729_p9, %p728_p5 }
  0x49   : > { %p731_p2 = pnand %p730_p1, %p724_p0 }
  0x4b   : > { %734 = shalt.err (!%p731_p2)
}
  0x4c   : > { %612 = dma.hbm_to_vmem [thread:$0]  (!%p978_p13), %s972_s25, 128, %s974_s6, %s213_s11  }
  0x4d   : > { %p1108_p7 = scmp.ne.s32.totalorder %s1102_s30, 0 }
  0x4e   : > { %s1010_s8 = sand.u32 (!%p1108_p7), 1, %s805_s19   ;;  %p1109_p3 = scmp.ne.s32.totalorder (!%p1108_p7), %s1100_s28, 0 }
  0x4f   : > { %232 = sbr.rel (%p1108_p7) target bundleno = 488 (0x1e8), region = 40  ;;  %s511_s17 = sshll.u32 (!%p1108_p7), %s1010_s8, 3 }
  0x50   : > { %s235_s12 = scalar_lea.sflag (!%p1108_p7), [#allocation4], %s1010_s8  ;;  %s238_s24 = scalar_lea.vmem (!%p1108_p7), [#allocation3], %s511_s17 }
  0x56   : > { %788 = dma.done.wait (%p1109_p3), %s235_s12, 128  }
  0x57   : > { %790 = vsyncadd (%p1109_p3), %s235_s12, 4294967168  ;;  %p1110_p13 = scmp.ne.s32.totalorder %s1098_s26, 0 }
  0x59   : > { %792 = dma.done.wait (%p1110_p13), [#allocation7], 2048  }
  0x5a   : > { %794 = vsyncadd (%p1110_p13), [#allocation7], 4294965248  ;;  %v827_v0 = vmov 0.0|0.0   ;;  %v273_v1 = vld [vmem:[%s238_s24] sm:$0xff]  ;;  %v305_v2 = vld [vmem:[#allocation6] sm:$0xff]  ;;  %vm828_vm0 = vmmov 0  }
  0x5b   : > { %573 = vmatprep.subr.bf16.mxu0 %v827_v0  ;;  %v306_v3 = vld [vmem:[#allocation6 + $0x8] sm:$0xff]  ;;  %274 = vadd.xlane.f32.xlu0 %v273_v1  ;;  %v277_v4 = vmul.f32 %v273_v1, %v273_v1  ;;  %v307_v6 = vld [vmem:[#allocation6 + $0x10] sm:$0xff]  ;;  %v308_v7 = vld [vmem:[#allocation6 + $0x18] sm:$0xff]  ;;  %v829_v20 = vmov 0.0   ;;  %s518_s11 = sshll.u32 %s813_s21, 7  ;;  %s268_s7 = scalar_lea.vmem [#allocation8], %s511_s17 }
  0x5c   : > { %v574_v5 = vpack.c.bf16 %v306_v3, %v305_v2  ;;  %v577_v8 = vpack.c.bf16 %v308_v7, %v307_v6  ;;  %v309_v9 = vld [vmem:[#allocation6 + $0x20] sm:$0xff]  ;;  %v310_v10 = vld [vmem:[#allocation6 + $0x28] sm:$0xff]  ;;  %v311_v12 = vld [vmem:[#allocation6 + $0x30] sm:$0xff]  ;;  %570 = vmatprep.mubr.msk.f32.mxu0 %vm828_vm0, %v829_v20  ;;  %s414_s27 = sshll.u32 %s268_s7, 4  ;;  %s1039_s12 = scalar_lea.hbm %s1093_s5, %s518_s11  ;;  %s1041_s27 = int_to_ptr.vmem [resolvable:$true] %s414_s27 }
  0x5d   : > { %v580_v11 = vpack.c.bf16 %v310_v10, %v309_v9  ;;  %v312_v13 = vld [vmem:[#allocation6 + $0x38] sm:$0xff]  ;;  %v313_v15 = vld [vmem:[#allocation6 + $0x40] sm:$0xff]  ;;  %v314_v16 = vld [vmem:[#allocation6 + $0x48] sm:$0xff]  ;;  %s400_s24 = scalar_lea.sflag [#allocation5], %s1010_s8  ;;  %s735_s26 = scalar_lea.vmem %s1041_s27, 128 }
  0x5e   : > { %575 = vmatpush3.bf16.msra.mxu0 %v574_v5  ;;  %v583_v14 = vpack.c.bf16 %v312_v13, %v311_v12  ;;  %v586_v17 = vpack.c.bf16 %v314_v16, %v313_v15  ;;  %v315_v18 = vld [vmem:[#allocation6 + $0x50] sm:$0xff]  ;;  %v316_v19 = vld [vmem:[#allocation6 + $0x58] sm:$0xff]  ;;  %v317_v22 = vld [vmem:[#allocation6 + $0x60] sm:$0xff]  ;;  %p736_p4 = scmp.ne.s32.totalorder %s1041_s27, %s735_s26  ;;  %s830_s21 = smov [#allocation8]  }
  0x5f   : > { %576 = vmatprep.subr.bf16.mxu0 %v827_v0  ;;  %278 = vadd.xlane.f32.xlu0 %v277_v4  ;;  %v589_v21 = vpack.c.bf16 %v316_v19, %v315_v18  ;;  %v318_v23 = vld [vmem:[#allocation6 + $0x68] sm:$0xff]  ;;  %v319_v25 = vld [vmem:[#allocation6 + $0x70] sm:$0xff]  ;;  %v320_v26 = vld [vmem:[#allocation6 + $0x78] sm:$0xff]  ;;  %s739_s17 = sshll.u32 %s830_s21, 4  ;;  %s740_s17 = int_to_ptr.vmem [resolvable:$false] %s739_s17 }
  0x60   : > { %v592_v24 = vpack.c.bf16 %v318_v23, %v317_v22  ;;  %v595_v27 = vpack.c.bf16 %v320_v26, %v319_v25  ;;  %v514_v37 = vld [vmem:[%s1089_s1] ss:$0 sm:$0xff]  ;;  %p737_p6 = pnand %p736_p4, %p957_p10  ;;  %s741_s28 = scalar_lea.vmem %s740_s17, 256 }
  0x61   : > { %v515_v39 = vld [vmem:[%s1090_s2] ss:$0 sm:$0xff]  ;;  %p742_p12 = scmp.lt.s32.totalorder %s1041_s27, %s740_s17  ;;  %p743_p11 = scmp.lt.s32.totalorder %s741_s28, %s735_s26 }
  0x62   : > { %578 = vmatpush3.bf16.msra.mxu0 %v577_v8  ;;  %v516_v42 = vld [vmem:[%s1092_s4] ss:$0 sm:$0xff]  ;;  %p738_p8 = pneg %p737_p6 }
  0x63   : > { %579 = vmatprep.subr.bf16.mxu0 %v827_v0  ;;  %p744_p0 = por %p743_p11, %p742_p12 }
  0x65   : > { %p745_p5 = pnand %p744_p0, %p738_p8 }
  0x66   : > { %581 = vmatpush3.bf16.msra.mxu0 %v580_v11 }
  0x67   : > { %582 = vmatprep.subr.bf16.mxu0 %v827_v0 }
  0x6a   : > { %584 = vmatpush3.bf16.msra.mxu0 %v583_v14 }
  0x6b   : > { %585 = vmatprep.subr.bf16.mxu0 %v827_v0 }
  0x6e   : > { %587 = vmatpush3.bf16.msra.mxu0 %v586_v17 }
  0x6f   : > { %588 = vmatprep.subr.bf16.mxu0 %v827_v0 }
  0x72   : > { %590 = vmatpush3.bf16.msra.mxu0 %v589_v21 }
  0x73   : > { %591 = vmatprep.subr.bf16.mxu0 %v827_v0 }
  0x76   : > { %593 = vmatpush3.bf16.msra.mxu0 %v592_v24 }
  0x77   : > { %594 = vmatprep.subr.bf16.mxu0 %v827_v0 }
  0x7a   : > { %596 = vmatpush3.bf16.msra.mxu0 %v595_v27 }
  0xe8   : > { %v275_v28 = vpop.xlane.xlu0 %274 }
  0xe9   : > { %v276_v29 = vmul.f32 0.03125, %v275_v28 }
  0xeb   : > { %v281_v31 = vmul.f32 %v276_v29, %v276_v29  ;;  %v283_v35 = vsub.f32 %v273_v1, %v276_v29 }
  0xec   : > { %v279_v30 = vpop.xlane.xlu0 %278 }
  0xed   : > { %v280_v32 = vmul.f32 0.03125, %v279_v30 }
  0xef   : > { %v282_v33 = vsub.f32 %v280_v32, %v281_v31 }
  0xf1   : > { %v284_v34 = vadd.f32 1e-05, %v282_v33 }
  0xf3   : > { %675 = vrsqrt.f32 %v284_v34 }
  0xfd   : > { %v676_v36 = vpop.eup %675 }
  0xfe   : > { %v286_v38 = vmul.f32 %v676_v36, %v283_v35 }
 0x100   : > { %v294_v40 = vmul.f32 %v514_v37, %v286_v38 }
 0x102   : > { %v302_v41 = vadd.f32 %v515_v39, %v294_v40 }
 0x104   : > { %571 = vmatmul.mubr.f32.vlgmr.msra.gmra.mrb[0].mxu0 %v302_v41 }
 0x1d7   : > { %v394_v43 = vpop.f32.mrb[0].mxu0 }
 0x1d8   : > { %v395_v44 = vadd.f32 %v516_v42, %v394_v43  ;;  %v572_v45 = vpop.f32.mrb[1].mxu0 }
 0x1da   : > { %398 = vst [vmem:[%s268_s7] sm:$0xff] %v395_v44 }
 0x1db   : > { %748 = shalt.err (!%p745_p5)
}
 0x1dc   : > { %s749_s8 = scalar_lea.hbm %s1039_s12, 128  ;;  %s753_s6 = scalar_lea.hbm %s1093_s5, 256 }
 0x1dd   : > { %p750_p9 = scmp.ne.s32.totalorder %s1039_s12, %s749_s8  ;;  %p754_p7 = scmp.lt.u32.totalorder %s1039_s12, %s1093_s5 }
 0x1de   : > { %p755_p3 = scmp.lt.u32.totalorder %s753_s6, %s749_s8  ;;  %p757_p4 = scmp.lt.u32.totalorder %s749_s8, %s1039_s12 }
 0x1df   : > { %p751_p1 = pnand %p750_p9, %p957_p10 }
 0x1e0   : > { %p756_p13 = por %p755_p3, %p754_p7 }
 0x1e1   : > { %p752_p2 = pneg %p751_p1 }
 0x1e2   : > { %p758_p6 = por %p757_p4, %p756_p13 }
 0x1e4   : > { %p759_p8 = pnand %p758_p6, %p752_p2 }
 0x1e6   : > { %762 = shalt.err (!%p759_p8)
}
 0x1e7   : > { %603 = dma.vmem_to_hbm [thread:$0]  (%p957_p10), %s1041_s27, 128, %s1039_s12, %s400_s24  }
 0x1e8 PF: > { %s426_s7 = sand.u32 1, %s801_s18   ;;  %p1111_p12 = scmp.ne.s32.totalorder %s1101_s29, 0 }
 0x1e9   : > { %p1112_p11 = scmp.ge.s32.totalorder %s821_s23, 2  ;;  %s427_s14 = scalar_lea.sflag [#allocation5], %s426_s7 }
 0x1eb   : > { %p614_p0 = pnand %p1112_p11, %p1111_p12 }
 0x1ed   : > { %796 = dma.done.wait (!%p614_p0), %s427_s14, 128  }
 0x1ee   : > { %798 = vsyncadd (!%p614_p0), %s427_s14, 4294967168  ;;  %s22_s23 = sadd.s32 1, %s821_s23   ;;  %s1113_s18 = smov %s805_s19 }
 0x1ef   : > { %p19_p5 = scmp.ge.s32.totalorder %s22_s23, 4   ;;  %s1114_s19 = smov %s809_s20 }
 0x1f0   : > { %s1115_s20 = smov %s966_s15  ;;  %s1116_s21 = smov %s817_s22 }
 0x1f1   : > { %s1117_s22 = smov %s1119_s9  ;;  %21 = sbr.rel (!%p19_p5) target bundleno = 7 (0x7), region = 93 }
 0x1f8   :  { %432 = vsyncpa [#allocation4], 1 }
 0x1f9   :  { %434 = vsyncpa [#allocation4 + $0x1], 1 }
 0x1fa   :  { %435 = vsyncpa [#allocation7], 1 }
 0x1fb   :  { %436 = vsyncpa [#allocation5], 1 }
 0x1fc   :  { %438 = vsyncpa [#allocation5 + $0x1], 1 }

// kernel: tpu_custom_call.1
= control target key start
LH: loop header
LB: loop body
LE: loop exit
PB: predicated region body
PF: predicated region fallthrough
CT: control target
= control target key end

     0   :  { %10 = vsyncpa [#allocation4], 0  ;;  %s1088_s0 = inlined_call_operand.hbm [shape: f32[16,128], index: 0, kind: input, shape index: {}]   ;;  %s1089_s1 = inlined_call_operand.vmem [shape: f32[1,128], index: 1, kind: input, shape index: {}]   ;;  %s1090_s2 = inlined_call_operand.vmem [shape: f32[1,128], index: 2, kind: input, shape index: {}]   ;;  %s1091_s3 = inlined_call_operand.hbm [shape: f32[128,128], index: 3, kind: input, shape index: {}]   ;;  %s1092_s4 = inlined_call_operand.vmem [shape: f32[1,128], index: 4, kind: input, shape index: {}]   ;;  %s1093_s5 = inlined_call_operand.hbm [shape: f32[16,128], index: 5, kind: output, shape index: {}]  }
   0x1   :  { %12 = vsyncpa [#allocation4 + $0x1], 0 }
   0x2   :  { %13 = vsyncpa [#allocation7], 0 }
   0x3   :  { %14 = vsyncpa [#allocation5], 0 }
   0x4   :  { %16 = vsyncpa [#allocation5 + $0x1], 0  ;;  %s861_s18 = smov 0   ;;  %s863_s19 = smov 0  }
   0x5   :  { %s865_s20 = smov 0   ;;  %s867_s21 = smov 0  }
   0x6   :  { %s869_s22 = smov 0   ;;  %s871_s23 = smov 0  }
   0x7 LB: > { %s503_s24 = sadd.s32 4294967295, %s821_s23   ;;  %s504_s25 = sadd.s32 4294967294, %s821_s23   ;;  %s821_s23 = sphi %s871_s23, %s22_s23   ;;  %s817_s22 = sphi %s869_s22, %s1117_s22   ;;  %s813_s21 = sphi %s867_s21, %s1116_s21   ;;  %s809_s20 = sphi %s865_s20, %s1115_s20   ;;  %s805_s19 = sphi %s863_s19, %s1114_s19   ;;  %s801_s18 = sphi %s861_s18, %s1113_s18  }
   0x8   : > { %p54_p0 = scmp.ne.s32.totalorder %s805_s19, %s801_s18  ;;  %p895_p1 = scmp.eq.s32.totalorder %s503_s24, 0 }
   0x9   : > { %p899_p2 = scmp.eq.s32.totalorder %s503_s24, 1  ;;  %p170_p3 = scmp.eq.s32.totalorder %s504_s25, 1 }
   0xa   : > { %s1098_s26 = scalar_select %p895_p1, 1, 0 }
   0xb   : > { %s1099_s27 = scalar_select %p899_p2, 1, 0 }
   0xc   : > { %p905_p4 = por %p895_p1, %p54_p0  ;;  %p505_p5 = scmp.ge.s32.totalorder %s821_s23, 1 }
   0xd   : > { %p910_p6 = por %p170_p3, %p54_p0  ;;  %p177_p7 = scmp.lt.s32.totalorder %s821_s23, 3 }
   0xe   : > { %s1100_s28 = scalar_select %p905_p4, 1, 0 }
   0xf   : > { %s1101_s29 = scalar_select %p910_p6, 1, 0 }
  0x10   : > { %p915_p8 = pnand %p505_p5, %p177_p7  ;;  %s823_s6 = smov [#allocation6]  }
  0x11   : > { %s195_s7 = sshll.u32 %s823_s6, 4  ;;  %s34_s9 = sadd.s32 1, %s817_s22  ;;  %s196_s7 = int_to_ptr.vmem [resolvable:$true] %s195_s7 }
  0x12   : > { %s1102_s30 = scalar_select %p915_p8, 1, 0 }
  0x13   : > { %p605_p9 = pneg %p915_p8  ;;  %s677_s12 = scalar_lea.hbm %s1091_s3, 2048 }
  0x14   : > { %p678_p12 = scmp.ne.s32.totalorder %s1091_s3, %s677_s12  ;;  %p684_p5 = scmp.lt.u32.totalorder %s677_s12, %s1091_s3 }
  0x15   : > { %p924_p11 = pnand %p605_p9, %p895_p1 }
  0x17   : > { %p679_p13 = pneg %p924_p11 }
  0x19   : > { %p680_p0 = pnand %p679_p13, %p678_p12 }
  0x1b   : > { %p681_p3 = pneg %p680_p0 }
  0x1d   : > { %p686_p7 = pnand %p684_p5, %p681_p3 }
  0x1f   : > { %689 = shalt.err (!%p686_p7)
}
  0x20   : > { %s690_s17 = scalar_lea.vmem %s196_s7, 2048  ;;  %p698_p1 = scmp.lt.s32.totalorder %s196_s7, %s196_s7 }
  0x21   : > { %p691_p9 = scmp.ne.s32.totalorder %s196_s7, %s690_s17  ;;  %p699_p4 = scmp.lt.s32.totalorder %s690_s17, %s690_s17 }
  0x23   : > { %p693_p10 = pnand %p691_p9, %p679_p13  ;;  %p700_p8 = por %p699_p4, %p698_p1 }
  0x25   : > { %p694_p6 = pneg %p693_p10 }
  0x27   : > { %p701_p2 = pnand %p700_p8, %p694_p6 }
  0x29   : > { %704 = shalt.err (!%p701_p2)
}
  0x2a   : > { %s824_s24 = smov 128   ;;  %s825_s25 = smov 8  }
  0x2b   : > { %608 = dma.hbm_to_vmem [thread:$0]  (!%p924_p11), %s1091_s3, 2048, %s196_s7, [#allocation7], %s824_s24, %s824_s24, %s825_s25  }
  0x2c   : > { %p36_p1 = scmp.ge.s32.totalorder %s34_s9, 2  ;;  %s41_s11 = sadd.s32 1, %s809_s20 }
  0x2d   : > { %p48_p2 = scmp.ne.s32.totalorder %s809_s20, %s805_s19  ;;  %p49_p4 = scmp.eq.s32.totalorder %s821_s23, 0 }
  0x2e   : > { %s1119_s9 = smov (%p36_p1, %s34_s9), 0  ;;  %p1105_p8 = scmp.ne.s32.totalorder %s1099_s27, 0 }
  0x2f   : > { %p951_p6 = por %p49_p4, %p48_p2  ;;  %s38_s8 = ssub.s32 %s817_s22, %s1119_s9 }
  0x30   : > { %p957_p10 = por %p1105_p8, %p48_p2  ;;  %p618_p12 = scmp.lt.s32.totalorder %s821_s23, 2 }
  0x31   : > { %p39_p11 = scmp.eq.s32.totalorder %s38_s8, 0  ;;  %s212_s7 = sand.u32 1, %s809_s20  }
  0x32   : > { %s508_s14 = sshll.u32 %s212_s7, 3  ;;  %s509_s16 = sshll.u32 %s817_s22, 7 }
  0x33   : > { %s966_s15 = scalar_select %p39_p11, %s809_s20, %s41_s11  }
  0x34   : > { %s972_s25 = scalar_lea.hbm %s1088_s0, %s509_s16  ;;  %s216_s27 = scalar_lea.vmem [#allocation3], %s508_s14 }
  0x35   : > { %s223_s6 = sshll.u32 %s216_s27, 4  ;;  %p978_p13 = pnand %p618_p12, %p951_p6  ;;  %s974_s6 = int_to_ptr.vmem [resolvable:$true] %s223_s6 }
  0x36   : > { %s213_s11 = scalar_lea.sflag [#allocation4], %s212_s7  ;;  %s705_s8 = scalar_lea.hbm %s972_s25, 128 }
  0x37   : > { %p706_p0 = scmp.ne.s32.totalorder %s972_s25, %s705_s8  ;;  %p707_p3 = pneg %p978_p13 }
  0x38   : > { %s710_s17 = scalar_lea.hbm %s1088_s0, 256  ;;  %p711_p9 = scmp.lt.u32.totalorder %s972_s25, %s1088_s0 }
  0x39   : > { %p708_p5 = pnand %p707_p3, %p706_p0  ;;  %p712_p1 = scmp.lt.u32.totalorder %s710_s17, %s705_s8 }
  0x3a   : > { %p714_p4 = scmp.lt.u32.totalorder %s705_s8, %s972_s25 }
  0x3b   : > { %p709_p7 = pneg %p708_p5  ;;  %p713_p2 = por %p712_p1, %p711_p9 }
  0x3d   : > { %p715_p6 = por %p714_p4, %p713_p2 }
  0x3f   : > { %p716_p8 = pnand %p715_p6, %p709_p7 }
  0x41   : > { %719 = shalt.err (!%p716_p8)
}
  0x42   : > { %s720_s7 = scalar_lea.vmem %s974_s6, 128  ;;  %s826_s27 = smov [#allocation3]  }
  0x43   : > { %p721_p12 = scmp.ne.s32.totalorder %s974_s6, %s720_s7  ;;  %s725_s14 = sshll.u32 %s826_s27, 4  ;;  %s726_s14 = int_to_ptr.vmem [resolvable:$false] %s725_s14 }
  0x44   : > { %s727_s16 = scalar_lea.vmem %s726_s14, 256  ;;  %p728_p5 = scmp.lt.s32.totalorder %s974_s6, %s726_s14 }
  0x45   : > { %p723_p11 = pnand %p721_p12, %p707_p3  ;;  %p729_p9 = scmp.lt.s32.totalorder %s727_s16, %s720_s7 }
  0x47   : > { %p724_p0 = pneg %p723_p11  ;;  %p730_p1 = por %p729_p9, %p728_p5 }
  0x49   : > { %p731_p2 = pnand %p730_p1, %p724_p0 }
  0x4b   : > { %734 = shalt.err (!%p731_p2)
}
  0x4c   : > { %612 = dma.hbm_to_vmem [thread:$0]  (!%p978_p13), %s972_s25, 128, %s974_s6, %s213_s11  }
  0x4d   : > { %p1108_p7 = scmp.ne.s32.totalorder %s1102_s30, 0 }
  0x4e   : > { %s1010_s8 = sand.u32 (!%p1108_p7), 1, %s805_s19   ;;  %p1109_p3 = scmp.ne.s32.totalorder (!%p1108_p7), %s1100_s28, 0 }
  0x4f   : > { %232 = sbr.rel (%p1108_p7) target bundleno = 488 (0x1e8), region = 40  ;;  %s511_s17 = sshll.u32 (!%p1108_p7), %s1010_s8, 3 }
  0x50   : > { %s235_s12 = scalar_lea.sflag (!%p1108_p7), [#allocation4], %s1010_s8  ;;  %s238_s24 = scalar_lea.vmem (!%p1108_p7), [#allocation3], %s511_s17 }
  0x56   : > { %788 = dma.done.wait (%p1109_p3), %s235_s12, 128  }
  0x57   : > { %790 = vsyncadd (%p1109_p3), %s235_s12, 4294967168  ;;  %p1110_p13 = scmp.ne.s32.totalorder %s1098_s26, 0 }
  0x59   : > { %792 = dma.done.wait (%p1110_p13), [#allocation7], 2048  }
  0x5a   : > { %794 = vsyncadd (%p1110_p13), [#allocation7], 4294965248  ;;  %v827_v0 = vmov 0.0|0.0   ;;  %v273_v1 = vld [vmem:[%s238_s24] sm:$0xff]  ;;  %v305_v2 = vld [vmem:[#allocation6] sm:$0xff]  ;;  %vm828_vm0 = vmmov 0  }
  0x5b   : > { %573 = vmatprep.subr.bf16.mxu0 %v827_v0  ;;  %v306_v3 = vld [vmem:[#allocation6 + $0x8] sm:$0xff]  ;;  %274 = vadd.xlane.f32.xlu0 %v273_v1  ;;  %v277_v4 = vmul.f32 %v273_v1, %v273_v1  ;;  %v307_v6 = vld [vmem:[#allocation6 + $0x10] sm:$0xff]  ;;  %v308_v7 = vld [vmem:[#allocation6 + $0x18] sm:$0xff]  ;;  %v829_v20 = vmov 0.0   ;;  %s518_s11 = sshll.u32 %s813_s21, 7  ;;  %s268_s7 = scalar_lea.vmem [#allocation8], %s511_s17 }
  0x5c   : > { %v574_v5 = vpack.c.bf16 %v306_v3, %v305_v2  ;;  %v577_v8 = vpack.c.bf16 %v308_v7, %v307_v6  ;;  %v309_v9 = vld [vmem:[#allocation6 + $0x20] sm:$0xff]  ;;  %v310_v10 = vld [vmem:[#allocation6 + $0x28] sm:$0xff]  ;;  %v311_v12 = vld [vmem:[#allocation6 + $0x30] sm:$0xff]  ;;  %570 = vmatprep.mubr.msk.f32.mxu0 %vm828_vm0, %v829_v20  ;;  %s414_s27 = sshll.u32 %s268_s7, 4  ;;  %s1039_s12 = scalar_lea.hbm %s1093_s5, %s518_s11  ;;  %s1041_s27 = int_to_ptr.vmem [resolvable:$true] %s414_s27 }
  0x5d   : > { %v580_v11 = vpack.c.bf16 %v310_v10, %v309_v9  ;;  %v312_v13 = vld [vmem:[#allocation6 + $0x38] sm:$0xff]  ;;  %v313_v15 = vld [vmem:[#allocation6 + $0x40] sm:$0xff]  ;;  %v314_v16 = vld [vmem:[#allocation6 + $0x48] sm:$0xff]  ;;  %s400_s24 = scalar_lea.sflag [#allocation5], %s1010_s8  ;;  %s735_s26 = scalar_lea.vmem %s1041_s27, 128 }
  0x5e   : > { %575 = vmatpush3.bf16.msra.mxu0 %v574_v5  ;;  %v583_v14 = vpack.c.bf16 %v312_v13, %v311_v12  ;;  %v586_v17 = vpack.c.bf16 %v314_v16, %v313_v15  ;;  %v315_v18 = vld [vmem:[#allocation6 + $0x50] sm:$0xff]  ;;  %v316_v19 = vld [vmem:[#allocation6 + $0x58] sm:$0xff]  ;;  %v317_v22 = vld [vmem:[#allocation6 + $0x60] sm:$0xff]  ;;  %p736_p4 = scmp.ne.s32.totalorder %s1041_s27, %s735_s26  ;;  %s830_s21 = smov [#allocation8]  }
  0x5f   : > { %576 = vmatprep.subr.bf16.mxu0 %v827_v0  ;;  %278 = vadd.xlane.f32.xlu0 %v277_v4  ;;  %v589_v21 = vpack.c.bf16 %v316_v19, %v315_v18  ;;  %v318_v23 = vld [vmem:[#allocation6 + $0x68] sm:$0xff]  ;;  %v319_v25 = vld [vmem:[#allocation6 + $0x70] sm:$0xff]  ;;  %v320_v26 = vld [vmem:[#allocation6 + $0x78] sm:$0xff]  ;;  %s739_s17 = sshll.u32 %s830_s21, 4  ;;  %s740_s17 = int_to_ptr.vmem [resolvable:$false] %s739_s17 }
  0x60   : > { %v592_v24 = vpack.c.bf16 %v318_v23, %v317_v22  ;;  %v595_v27 = vpack.c.bf16 %v320_v26, %v319_v25  ;;  %v514_v37 = vld [vmem:[%s1089_s1] ss:$0 sm:$0xff]  ;;  %p737_p6 = pnand %p736_p4, %p957_p10  ;;  %s741_s28 = scalar_lea.vmem %s740_s17, 256 }
  0x61   : > { %v515_v39 = vld [vmem:[%s1090_s2] ss:$0 sm:$0xff]  ;;  %p742_p12 = scmp.lt.s32.totalorder %s1041_s27, %s740_s17  ;;  %p743_p11 = scmp.lt.s32.totalorder %s741_s28, %s735_s26 }
  0x62   : > { %578 = vmatpush3.bf16.msra.mxu0 %v577_v8  ;;  %v516_v42 = vld [vmem:[%s1092_s4] ss:$0 sm:$0xff]  ;;  %p738_p8 = pneg %p737_p6 }
  0x63   : > { %579 = vmatprep.subr.bf16.mxu0 %v827_v0  ;;  %p744_p0 = por %p743_p11, %p742_p12 }
  0x65   : > { %p745_p5 = pnand %p744_p0, %p738_p8 }
  0x66   : > { %581 = vmatpush3.bf16.msra.mxu0 %v580_v11 }
  0x67   : > { %582 = vmatprep.subr.bf16.mxu0 %v827_v0 }
  0x6a   : > { %584 = vmatpush3.bf16.msra.mxu0 %v583_v14 }
  0x6b   : > { %585 = vmatprep.subr.bf16.mxu0 %v827_v0 }
  0x6e   : > { %587 = vmatpush3.bf16.msra.mxu0 %v586_v17 }
  0x6f   : > { %588 = vmatprep.subr.bf16.mxu0 %v827_v0 }
  0x72   : > { %590 = vmatpush3.bf16.msra.mxu0 %v589_v21 }
  0x73   : > { %591 = vmatprep.subr.bf16.mxu0 %v827_v0 }
  0x76   : > { %593 = vmatpush3.bf16.msra.mxu0 %v592_v24 }
  0x77   : > { %594 = vmatprep.subr.bf16.mxu0 %v827_v0 }
  0x7a   : > { %596 = vmatpush3.bf16.msra.mxu0 %v595_v27 }
  0xe8   : > { %v275_v28 = vpop.xlane.xlu0 %274 }
  0xe9   : > { %v276_v29 = vmul.f32 0.03125, %v275_v28 }
  0xeb   : > { %v281_v31 = vmul.f32 %v276_v29, %v276_v29  ;;  %v283_v35 = vsub.f32 %v273_v1, %v276_v29 }
  0xec   : > { %v279_v30 = vpop.xlane.xlu0 %278 }
  0xed   : > { %v280_v32 = vmul.f32 0.03125, %v279_v30 }
  0xef   : > { %v282_v33 = vsub.f32 %v280_v32, %v281_v31 }
  0xf1   : > { %v284_v34 = vadd.f32 1e-05, %v282_v33 }
  0xf3   : > { %675 = vrsqrt.f32 %v284_v34 }
  0xfd   : > { %v676_v36 = vpop.eup %675 }
  0xfe   : > { %v286_v38 = vmul.f32 %v676_v36, %v283_v35 }
 0x100   : > { %v294_v40 = vmul.f32 %v514_v37, %v286_v38 }
 0x102   : > { %v302_v41 = vadd.f32 %v515_v39, %v294_v40 }
 0x104   : > { %571 = vmatmul.mubr.f32.vlgmr.msra.gmra.mrb[0].mxu0 %v302_v41 }
 0x1d7   : > { %v394_v43 = vpop.f32.mrb[0].mxu0 }
 0x1d8   : > { %v395_v44 = vadd.f32 %v516_v42, %v394_v43  ;;  %v572_v45 = vpop.f32.mrb[1].mxu0 }
 0x1da   : > { %398 = vst [vmem:[%s268_s7] sm:$0xff] %v395_v44 }
 0x1db   : > { %748 = shalt.err (!%p745_p5)
}
 0x1dc   : > { %s749_s8 = scalar_lea.hbm %s1039_s12, 128  ;;  %s753_s6 = scalar_lea.hbm %s1093_s5, 256 }
 0x1dd   : > { %p750_p9 = scmp.ne.s32.totalorder %s1039_s12, %s749_s8  ;;  %p754_p7 = scmp.lt.u32.totalorder %s1039_s12, %s1093_s5 }
 0x1de   : > { %p755_p3 = scmp.lt.u32.totalorder %s753_s6, %s749_s8  ;;  %p757_p4 = scmp.lt.u32.totalorder %s749_s8, %s1039_s12 }
 0x1df   : > { %p751_p1 = pnand %p750_p9, %p957_p10 }
 0x1e0   : > { %p756_p13 = por %p755_p3, %p754_p7 }
 0x1e1   : > { %p752_p2 = pneg %p751_p1 }
 0x1e2   : > { %p758_p6 = por %p757_p4, %p756_p13 }
 0x1e4   : > { %p759_p8 = pnand %p758_p6, %p752_p2 }
 0x1e6   : > { %762 = shalt.err (!%p759_p8)
}
 0x1e7   : > { %603 = dma.vmem_to_hbm [thread:$0]  (%p957_p10), %s1041_s27, 128, %s1039_s12, %s400_s24  }
 0x1e8 PF: > { %s426_s7 = sand.u32 1, %s801_s18   ;;  %p1111_p12 = scmp.ne.s32.totalorder %s1101_s29, 0 }
 0x1e9   : > { %p1112_p11 = scmp.ge.s32.totalorder %s821_s23, 2  ;;  %s427_s14 = scalar_lea.sflag [#allocation5], %s426_s7 }
 0x1eb   : > { %p614_p0 = pnand %p1112_p11, %p1111_p12 }
 0x1ed   : > { %796 = dma.done.wait (!%p614_p0), %s427_s14, 128  }
 0x1ee   : > { %798 = vsyncadd (!%p614_p0), %s427_s14, 4294967168  ;;  %s22_s23 = sadd.s32 1, %s821_s23   ;;  %s1113_s18 = smov %s805_s19 }
 0x1ef   : > { %p19_p5 = scmp.ge.s32.totalorder %s22_s23, 4   ;;  %s1114_s19 = smov %s809_s20 }
 0x1f0   : > { %s1115_s20 = smov %s966_s15  ;;  %s1116_s21 = smov %s817_s22 }
 0x1f1   : > { %s1117_s22 = smov %s1119_s9  ;;  %21 = sbr.rel (!%p19_p5) target bundleno = 7 (0x7), region = 93 }
 0x1f8   :  { %432 = vsyncpa [#allocation4], 1 }
 0x1f9   :  { %434 = vsyncpa [#allocation4 + $0x1], 1 }
 0x1fa   :  { %435 = vsyncpa [#allocation7], 1 }
 0x1fb   :  { %436 = vsyncpa [#allocation5], 1 }
 0x1fc   :  { %438 = vsyncpa [#allocation5 + $0x1], 1 }

</bundles_post_ra>
